<compile_context>
chip_gen: v7x
topology: tpu7x:2x2x1
jax: 0.10.0
libtpu: 0.0.40
codegen_flags: <defaults>
</compile_context>

<pallas_src>
import functools

import jax
import jax.numpy as jnp
from jax import lax
from jax.experimental import pallas as pl
from jax.experimental.pallas import tpu as pltpu


def _round_up(x, m):
    return (x + m - 1) // m * m


# ----------------------------------------------------------------------------
# Pallas kernel: one (b, ho) slab  ->  one (Wo, E_pad) output tile.
# ----------------------------------------------------------------------------
def _patch_embed_kernel(x_ref, w_ref, b_ref, o_ref, *, kh):
    # x_ref: (1, kh, Wo, kw*C)  bf16 input slab for this (b, ho)
    # w_ref: (kh, kw*C, E_pad)  bf16 conv weight (kernel-row major), VMEM-resident
    # b_ref: (1, E_pad)         f32 bias, VMEM-resident
    # o_ref: (1, Wo, E_pad)
    acc = jnp.dot(x_ref[0, 0], w_ref[0], preferred_element_type=jnp.float32)
    for dh in range(1, kh):  # static, small unroll over kernel rows
        acc = acc + jnp.dot(x_ref[0, dh], w_ref[dh],
                            preferred_element_type=jnp.float32)
    o_ref[0] = (acc + b_ref[...]).astype(o_ref.dtype)


def _patch_proj(xrows, w_k, bias_row, *, kh, out_dtype):
    R, _, Wo, KC = xrows.shape           # R = B*Ho
    _, _, E_pad = w_k.shape

    flops = 2 * R * Wo * kh * KC * E_pad
    bytes_accessed = (xrows.size * xrows.dtype.itemsize
                      + w_k.size * w_k.dtype.itemsize
                      + bias_row.size * bias_row.dtype.itemsize
                      + R * Wo * E_pad * jnp.dtype(out_dtype).itemsize)

    return pl.pallas_call(
        functools.partial(_patch_embed_kernel, kh=kh),
        out_shape=jax.ShapeDtypeStruct((R, Wo, E_pad), out_dtype),
        grid=(R,),
        in_specs=[
            pl.BlockSpec((1, kh, Wo, KC), lambda i: (i, 0, 0, 0)),
            pl.BlockSpec((kh, KC, E_pad), lambda i: (0, 0, 0)),   # resident
            pl.BlockSpec((1, E_pad), lambda i: (0, 0)),           # resident
        ],
        out_specs=pl.BlockSpec((1, Wo, E_pad), lambda i: (i, 0, 0)),
        compiler_params=pltpu.CompilerParams(
            dimension_semantics=("parallel",),
            vmem_limit_bytes=32 * 1024 * 1024),
        cost_estimate=pl.CostEstimate(
            flops=flops, transcendentals=0, bytes_accessed=bytes_accessed),
    )(xrows, w_k, bias_row)


# ----------------------------------------------------------------------------
# PatchEmbed forward.
# ----------------------------------------------------------------------------
def patch_embed_forward(x, weight, bias, *, kernel_size, stride, padding):
    """x: (B, C, H, W) NCHW.  weight: (embed_dim, C, kh, kw).  bias: (embed_dim,).

    Returns (B, Ho, Wo, embed_dim)  (NHWC, matching PyTorch's permute(0,2,3,1)).
    """
    B, C, H, W = x.shape
    kh, kw = kernel_size
    sh, sw = stride
    ph, pw = padding
    E = weight.shape[0]

    Ho = (H + 2 * ph - kh) // sh + 1
    Wo = (W + 2 * pw - kw) // sw + 1
    E_pad = _round_up(E, 128)
    compute_dtype = jnp.bfloat16

    # NCHW -> NHWC + zero pad (one cheap fused XLA pass; no im2col gather).
    x_nhwc = jnp.transpose(x, (0, 2, 3, 1))
    x_pad = jnp.pad(x_nhwc, ((0, 0), (ph, ph), (pw, pw), (0, 0)))

    if (sh, sw) == (kh, kw):
        # Non-overlapping patches (standard ViT): just a slice + free reshapes.
        x_g = x_pad[:, :Ho * kh, :Wo * kw, :]
    else:
        # TODO(synk): general stride != kernel falls back to an XLA gather of
        # the needed rows/cols; the Pallas matmul kernel below is unchanged.
        ridx = (jnp.arange(Ho)[:, None] * sh + jnp.arange(kh)[None, :]).reshape(-1)
        cidx = (jnp.arange(Wo)[:, None] * sw + jnp.arange(kw)[None, :]).reshape(-1)
        x_g = x_pad[:, ridx][:, :, cidx]

    # (B, Ho*kh, Wo*kw, C) -> (B*Ho, kh, Wo, kw*C): pure row-major reshapes.
    xrows = x_g.reshape(B * Ho, kh, Wo, kw * C).astype(compute_dtype)

    # Conv weight (E, C, kh, kw) -> (kh, kw*C, E_pad) so the flattened K order
    # (dw, c) matches xrows' last dim; pad E to a lane-aligned width.
    w_k = jnp.transpose(weight, (2, 3, 1, 0)).reshape(kh, kw * C, E)
    w_k = jnp.pad(w_k, ((0, 0), (0, 0), (0, E_pad - E))).astype(compute_dtype)

    bias_row = jnp.pad(bias.astype(jnp.float32), (0, E_pad - E)).reshape(1, E_pad)

    out = _patch_proj(xrows, w_k, bias_row, kh=kh, out_dtype=x.dtype)
    out = out.reshape(B, Ho, Wo, E_pad)[..., :E]
    return out


# ----------------------------------------------------------------------------
# Main
# ----------------------------------------------------------------------------
if __name__ == "__main__":
    # Small shapes consistent with the module's forward:
    #   batch=2, in_chans=4, spatial=16x16, kernel=(4,4), stride=(4,4),
    #   padding=(1,1), embed_dim=32  ->  output (2, 4, 4, 32)
    B, C, H, W = 2, 4, 16, 16
    kernel_size = (4, 4)
    stride = (4, 4)
    padding = (1, 1)
    embed_dim = 32

    key = jax.random.PRNGKey(0)
    kx, kw_, kb = jax.random.split(key, 3)

    x = jax.random.normal(kx, (B, C, H, W), dtype=jnp.float32)
    fan_in = C * kernel_size[0] * kernel_size[1]
    weight = jax.random.normal(kw_, (embed_dim, C, *kernel_size),
                               dtype=jnp.float32) * (1.0 / fan_in) ** 0.5
    bias = jax.random.normal(kb, (embed_dim,), dtype=jnp.float32) * 0.01

    fwd = jax.jit(functools.partial(
        patch_embed_forward, kernel_size=kernel_size, stride=stride,
        padding=padding))
    out = fwd(x, weight, bias)
    out = jax.block_until_ready(out)

    Ho = (H + 2 * padding[0] - kernel_size[0]) // stride[0] + 1
    Wo = (W + 2 * padding[1] - kernel_size[1]) // stride[1] + 1
    assert out.shape == (B, Ho, Wo, embed_dim), out.shape

    # Reference: XLA conv on bf16-rounded inputs (kernel feeds the MXU bf16
    # operands with f32 accumulation), NCHW -> permuted to NHWC.
    x_r = x.astype(jnp.bfloat16).astype(jnp.float32)
    w_r = weight.astype(jnp.bfloat16).astype(jnp.float32)
    ref = lax.conv_general_dilated(
        x_r, w_r, window_strides=stride,
        padding=[(padding[0], padding[0]), (padding[1], padding[1])],
        dimension_numbers=("NCHW", "OIHW", "NCHW"),
        preferred_element_type=jnp.float32,
    ) + bias[None, :, None, None]
    ref = jnp.transpose(ref, (0, 2, 3, 1))

    assert jnp.allclose(out, ref, atol=5e-3, rtol=5e-3), float(
        jnp.max(jnp.abs(out - ref)))

    print("KERNEL_OK")
</pallas_src>

<mosaic_0001>
module attributes {stable_mosaic.version = 11 : i64} {
  func.func @_patch_embed_kernel(%arg0: i32, %arg1: memref<1x4x4x16xbf16, #tpu.memory_space<vmem>>, %arg2: memref<4x16x128xbf16, #tpu.memory_space<vmem>>, %arg3: memref<1x128xf32, #tpu.memory_space<vmem>>, %arg4: memref<1x4x128xf32, #tpu.memory_space<vmem>>) attributes {dimension_semantics = [#tpu.dimension_semantics<parallel>], iteration_bounds = array<i64: 8>, scalar_prefetch = 0 : i64, scratch_operands = 0 : i64, tpu.core_type = #tpu.core_type<tc>, window_params = [{transform_indices = @transform_0, window_bounds = array<i64: 1, 4, 4, 16>}, {pipeline_mode = #tpu.pipeline_mode<synchronous>, transform_indices = @transform_1, window_bounds = array<i64: 4, 16, 128>}, {pipeline_mode = #tpu.pipeline_mode<synchronous>, transform_indices = @transform_2, window_bounds = array<i64: 1, 128>}, {transform_indices = @transform_3, window_bounds = array<i64: 1, 4, 128>}]} {
    %c0 = arith.constant 0 : index
    %c0_0 = arith.constant 0 : index
    %c0_1 = arith.constant 0 : index
    %c0_2 = arith.constant 0 : index
    %0 = vector.load %arg1[%c0, %c0_0, %c0_1, %c0_2] : memref<1x4x4x16xbf16, #tpu.memory_space<vmem>>, vector<1x1x4x16xbf16>
    %1 = vector.shape_cast %0 : vector<1x1x4x16xbf16> to vector<4x16xbf16>
    %c0_3 = arith.constant 0 : index
    %c0_4 = arith.constant 0 : index
    %c0_5 = arith.constant 0 : index
    %2 = vector.load %arg2[%c0_3, %c0_4, %c0_5] : memref<4x16x128xbf16, #tpu.memory_space<vmem>>, vector<1x16x128xbf16>
    %3 = vector.shape_cast %2 : vector<1x16x128xbf16> to vector<16x128xbf16>
    %cst = arith.constant dense<0.000000e+00> : vector<4x128xf32>
    %4 = tpu.matmul %1, %3, %cst {dimension_numbers = #tpu.dot_dimension_numbers<[1], [0], [0], [1], [0, 0, 1, 1], [], []>} : vector<4x16xbf16>, vector<16x128xbf16>, vector<4x128xf32> -> vector<4x128xf32>
    %c0_6 = arith.constant 0 : index
    %c1 = arith.constant 1 : index
    %c0_7 = arith.constant 0 : index
    %c0_8 = arith.constant 0 : index
    %5 = vector.load %arg1[%c0_6, %c1, %c0_7, %c0_8] : memref<1x4x4x16xbf16, #tpu.memory_space<vmem>>, vector<1x1x4x16xbf16>
    %6 = vector.shape_cast %5 : vector<1x1x4x16xbf16> to vector<4x16xbf16>
    %c1_9 = arith.constant 1 : index
    %c0_10 = arith.constant 0 : index
    %c0_11 = arith.constant 0 : index
    %7 = vector.load %arg2[%c1_9, %c0_10, %c0_11] : memref<4x16x128xbf16, #tpu.memory_space<vmem>>, vector<1x16x128xbf16>
    %8 = vector.shape_cast %7 : vector<1x16x128xbf16> to vector<16x128xbf16>
    %cst_12 = arith.constant dense<0.000000e+00> : vector<4x128xf32>
    %9 = tpu.matmul %6, %8, %cst_12 {dimension_numbers = #tpu.dot_dimension_numbers<[1], [0], [0], [1], [0, 0, 1, 1], [], []>} : vector<4x16xbf16>, vector<16x128xbf16>, vector<4x128xf32> -> vector<4x128xf32>
    %10 = arith.addf %4, %9 : vector<4x128xf32>
    %c0_13 = arith.constant 0 : index
    %c2 = arith.constant 2 : index
    %c0_14 = arith.constant 0 : index
    %c0_15 = arith.constant 0 : index
    %11 = vector.load %arg1[%c0_13, %c2, %c0_14, %c0_15] : memref<1x4x4x16xbf16, #tpu.memory_space<vmem>>, vector<1x1x4x16xbf16>
    %12 = vector.shape_cast %11 : vector<1x1x4x16xbf16> to vector<4x16xbf16>
    %c2_16 = arith.constant 2 : index
    %c0_17 = arith.constant 0 : index
    %c0_18 = arith.constant 0 : index
    %13 = vector.load %arg2[%c2_16, %c0_17, %c0_18] : memref<4x16x128xbf16, #tpu.memory_space<vmem>>, vector<1x16x128xbf16>
    %14 = vector.shape_cast %13 : vector<1x16x128xbf16> to vector<16x128xbf16>
    %cst_19 = arith.constant dense<0.000000e+00> : vector<4x128xf32>
    %15 = tpu.matmul %12, %14, %cst_19 {dimension_numbers = #tpu.dot_dimension_numbers<[1], [0], [0], [1], [0, 0, 1, 1], [], []>} : vector<4x16xbf16>, vector<16x128xbf16>, vector<4x128xf32> -> vector<4x128xf32>
    %16 = arith.addf %10, %15 : vector<4x128xf32>
    %c0_20 = arith.constant 0 : index
    %c3 = arith.constant 3 : index
    %c0_21 = arith.constant 0 : index
    %c0_22 = arith.constant 0 : index
    %17 = vector.load %arg1[%c0_20, %c3, %c0_21, %c0_22] : memref<1x4x4x16xbf16, #tpu.memory_space<vmem>>, vector<1x1x4x16xbf16>
    %18 = vector.shape_cast %17 : vector<1x1x4x16xbf16> to vector<4x16xbf16>
    %c3_23 = arith.constant 3 : index
    %c0_24 = arith.constant 0 : index
    %c0_25 = arith.constant 0 : index
    %19 = vector.load %arg2[%c3_23, %c0_24, %c0_25] : memref<4x16x128xbf16, #tpu.memory_space<vmem>>, vector<1x16x128xbf16>
    %20 = vector.shape_cast %19 : vector<1x16x128xbf16> to vector<16x128xbf16>
    %cst_26 = arith.constant dense<0.000000e+00> : vector<4x128xf32>
    %21 = tpu.matmul %18, %20, %cst_26 {dimension_numbers = #tpu.dot_dimension_numbers<[1], [0], [0], [1], [0, 0, 1, 1], [], []>} : vector<4x16xbf16>, vector<16x128xbf16>, vector<4x128xf32> -> vector<4x128xf32>
    %22 = arith.addf %16, %21 : vector<4x128xf32>
    %c0_27 = arith.constant 0 : index
    %c0_28 = arith.constant 0 : index
    %23 = vector.load %arg3[%c0_27, %c0_28] : memref<1x128xf32, #tpu.memory_space<vmem>>, vector<1x128xf32>
    %24 = vector.broadcast %23 : vector<1x128xf32> to vector<4x128xf32>
    %25 = arith.addf %22, %24 : vector<4x128xf32>
    %c0_29 = arith.constant 0 : index
    %c0_30 = arith.constant 0 : index
    %c0_31 = arith.constant 0 : index
    %26 = vector.load %arg4[%c0_29, %c0_30, %c0_31] : memref<1x4x128xf32, #tpu.memory_space<vmem>>, vector<1x4x128xf32>
    %27 = vector.shape_cast %26 : vector<1x4x128xf32> to vector<4x128xf32>
    %28 = vector.shape_cast %25 : vector<4x128xf32> to vector<1x4x128xf32>
    tpu.vector_store %arg4[%c0_29, %c0_30, %c0_31], %28 {strides = array<i32>} : memref<1x4x128xf32, #tpu.memory_space<vmem>>, vector<1x4x128xf32>,
    return
  }
  func.func @transform_0(%arg0: i32) -> (i32, i32, i32, i32) {
    %c0_i32 = arith.constant 0 : i32
    %c0_i32_0 = arith.constant 0 : i32
    %c0_i32_1 = arith.constant 0 : i32
    %c0_i32_2 = arith.constant 0 : i32
    return %arg0, %c0_i32, %c0_i32_0, %c0_i32_1 : i32, i32, i32, i32
  }
  func.func @transform_1(%arg0: i32) -> (i32, i32, i32) {
    %c0_i32 = arith.constant 0 : i32
    %c0_i32_0 = arith.constant 0 : i32
    %c0_i32_1 = arith.constant 0 : i32
    %c0_i32_2 = arith.constant 0 : i32
    return %c0_i32, %c0_i32_0, %c0_i32_1 : i32, i32, i32
  }
  func.func @transform_2(%arg0: i32) -> (i32, i32) {
    %c0_i32 = arith.constant 0 : i32
    %c0_i32_0 = arith.constant 0 : i32
    %c0_i32_1 = arith.constant 0 : i32
    return %c0_i32, %c0_i32_0 : i32, i32
  }
  func.func @transform_3(%arg0: i32) -> (i32, i32, i32) {
    %c0_i32 = arith.constant 0 : i32
    %c0_i32_0 = arith.constant 0 : i32
    %c0_i32_1 = arith.constant 0 : i32
    return %arg0, %c0_i32, %c0_i32_0 : i32, i32, i32
  }
}

</mosaic_0001>

<bundles_post_ra>
// kernel: patch_embed_forward.1
= control target key start
LH: loop header
LB: loop body
LE: loop exit
PB: predicated region body
PF: predicated region fallthrough
CT: control target
= control target key end

     0   :  { %8 = vsyncpa [#allocation3], 0  ;;  %s782_s0 = inlined_call_operand.vmem [shape: bf16[8,4,4,16], index: 0, kind: input, shape index: {}]   ;;  %s783_s1 = inlined_call_operand.vmem [shape: bf16[4,16,128], index: 1, kind: input, shape index: {}]   ;;  %s784_s2 = inlined_call_operand.vmem [shape: f32[1,128], index: 2, kind: input, shape index: {}]   ;;  %s785_s3 = inlined_call_operand.hbm [shape: f32[8,4,128], index: 3, kind: output, shape index: {}]  }
   0x1   :  { %10 = vsyncpa [#allocation3 + $0x1], 0  ;;  %s663_s12 = smov 0   ;;  %s665_s13 = smov 0  }
   0x2   :  { %s667_s14 = smov 0   ;;  %s669_s15 = smov 0  }
   0x3 LB: > { %s684_s16 = sadd.s32 4294967295, %s638_s15   ;;  %s469_s17 = sadd.s32 4294967294, %s638_s15   ;;  %s638_s15 = sphi %s669_s15, %s791_s15   ;;  %s634_s14 = sphi %s667_s14, %s790_s14   ;;  %s630_s13 = sphi %s665_s13, %s789_s13   ;;  %s626_s12 = sphi %s663_s12, %s788_s12  }
   0x4   : > { %s688_s18 = sadd.s32 1, %s638_s15   ;;  %s91_s19 = sadd.s32 1, %s634_s14 }
   0x5   : > { %s88_s20 = ssub.s32 %s638_s15, %s688_s18  ;;  %p101_p0 = scmp.ne.s32.totalorder %s634_s14, %s630_s13 }
   0x6   : > { %p89_p1 = scmp.eq.s32.totalorder %s88_s20, 0  ;;  %p102_p2 = scmp.eq.s32.totalorder %s684_s16, 7 }
   0x7   : > { %p107_p3 = scmp.ne.s32.totalorder %s630_s13, %s626_s12  ;;  %p108_p4 = scmp.eq.s32.totalorder %s469_s17, 7 }
   0x8   : > { %s699_s21 = scalar_select %p89_p1, %s634_s14, %s91_s19  }
   0x9   : > { %p701_p5 = por %p102_p2, %p101_p0  ;;  %p705_p6 = por %p108_p4, %p107_p3 }
   0xa   : > { %p472_p7 = scmp.ge.s32.totalorder %s638_s15, 1  ;;  %p140_p8 = scmp.lt.s32.totalorder %s638_s15, 9 }
   0xc   : > { %p141_p9 = pnand %p472_p7, %p140_p8 }
   0xd   : > { %v572_v0 = vld [vmem:[%s783_s1 + $0x8] sm:$0xff] (!%p141_p9)   ;;  %v640_v1 = vmov (!%p141_p9), 0.0   ;;  %v573_v2 = vld [vmem:[%s783_s1] sm:$0xff] (!%p141_p9)   ;;  %vm641_vm0 = vmmov (!%p141_p9), 0   ;;  %p164_p10 = scmp.lt.s32.totalorder (!%p141_p9), %s684_s16, 7  ;;  %vm184_vm1 = vcmask (!%p141_p9), 130048  }
   0xe   : > { %144 = sbr.rel (%p141_p9) target bundleno = 266 (0x10a), region = 32  ;;  %507 = vmatprep.subr.bf16.mxu0 (!%p141_p9), %v640_v1  ;;  %513 = vmatprep.subr.bf16.mxu1 (!%p141_p9), %v640_v1  ;;  %v574_v3 = vld [vmem:[%s783_s1 + $0x10] sm:$0xff] (!%p141_p9)   ;;  %v575_v4 = vld [vmem:[%s783_s1 + $0x18] sm:$0xff] (!%p141_p9)   ;;  %s161_s10 = sand.u32 (!%p141_p9), 1, %s630_s13   ;;  %v493_v23 = vld [vmem:[%s784_s2] ss:$0 sm:$0xff] (!%p141_p9) }
   0xf   : > { %508 = vmatpush3.bf16.msra.mxu0 (!%p141_p9), %v572_v0  ;;  %509 = vmatprep.mubr.msk.bf16.mxu0 (!%p141_p9), %vm641_vm0, %v640_v1  ;;  %s473_s11 = sshll.u32 (!%p141_p9), %s161_s10, 2  ;;  %s495_s20 = sshll.u32 (!%p141_p9), %s684_s16, 6 }
  0x10   : > { %514 = vmatpush3.bf16.msra.mxu1 (!%p141_p9), %v573_v2  ;;  %515 = vmatprep.mubr.msk.bf16.mxu1 (!%p141_p9), %vm641_vm0, %v640_v1  ;;  %s163_s24 = scalar_lea.vmem (!%p141_p9), [#allocation2], %s473_s11 }
  0x11   : > { %519 = vmatprep.subr.bf16.mxu0 (!%p141_p9), %v640_v1  ;;  %525 = vmatprep.subr.bf16.mxu1 (!%p141_p9), %v640_v1  ;;  %s410_s25 = sshll.u32 (!%p141_p9), %s163_s24, 4  ;;  %s742_s25 = int_to_ptr.vmem [resolvable:$true] %s410_s25 }
  0x12   : > { %s576_s30 = scalar_lea.vmem (!%p141_p9), %s742_s25, 64 }
  0x13   : > { %p577_p11 = scmp.ne.s32.totalorder (!%p141_p9), %s742_s25, %s576_s30 }
  0x15   : > { %s165_s28 = scalar_select %p164_p10, %s684_s16, 7 }
  0x16   : > { %p578_p12 = pnand %p577_p11, %p701_p5  ;;  %s642_s16 = smov [#allocation2]  }
  0x17   : > { %s498_s29 = sshll.u32 %s165_s28, 3  ;;  %s740_s28 = scalar_lea.hbm %s785_s3, %s495_s20 }
  0x18   : > { %s168_s9 = scalar_lea.vmem %s782_s0, %s498_s29  ;;  %s397_s29 = scalar_lea.sflag [#allocation3], %s161_s10 }
  0x19   : > { %v476_v5 = vld [vmem:[%s168_s9 + $0x2] sm:$0x3]  ;;  %v170_v6 = vld [vmem:[%s168_s9] sm:$0x3]  ;;  %v483_v7 = vld [vmem:[%s168_s9 + $0x4] sm:$0x3]  ;;  %p579_p13 = pneg %p578_p12 }
  0x1a   : > { %510 = vmatmul.mubr.msk.bf16.vlgmr.msra.gmra.mrb[0].mxu0 %vm184_vm1, %v476_v5  ;;  %516 = vmatmul.mubr.msk.bf16.vlgmr.msra.gmra.mrb[0].mxu1 %vm184_vm1, %v170_v6  ;;  %v488_v8 = vld [vmem:[%s168_s9 + $0x6] sm:$0x3]  ;;  %s580_s4 = sshll.u32 %s642_s16, 4  ;;  %s581_s4 = int_to_ptr.vmem [resolvable:$false] %s580_s4 }
  0x1b   : > { %520 = vmatpush3.bf16.msra.mxu0 %v574_v3  ;;  %526 = vmatpush3.bf16.msra.mxu1 %v575_v4  ;;  %s582_s5 = scalar_lea.vmem %s581_s4, 128  ;;  %p583_p0 = scmp.lt.s32.totalorder %s742_s25, %s581_s4 }
  0x1c   : > { %521 = vmatprep.mubr.msk.bf16.mxu0 %vm641_vm0, %v640_v1  ;;  %527 = vmatprep.mubr.msk.bf16.mxu1 %vm641_vm0, %v640_v1  ;;  %p584_p1 = scmp.lt.s32.totalorder %s582_s5, %s576_s30 }
  0x1e   : > { %p585_p2 = por %p584_p1, %p583_p0 }
  0x20   : > { %p586_p3 = pnand %p585_p2, %p579_p13 }
  0x22   : > { %522 = vmatmul.mubr.msk.bf16.vlgmr.msra.gmra.mrb[4].mxu0 %vm184_vm1, %v483_v7  ;;  %528 = vmatmul.mubr.msk.bf16.vlgmr.msra.gmra.mrb[4].mxu1 %vm184_vm1, %v488_v8 }
  0xed   : > { %v222_v9 = vpop.f32.mrb[0].mxu0  ;;  %v271_v10 = vpop.f32.mrb[0].mxu1 }
  0xee   : > { %v272_v11 = vadd.f32 %v271_v10, %v222_v9  ;;  %v511_v12 = vpop.f32.mrb[1].mxu0  ;;  %v517_v13 = vpop.f32.mrb[1].mxu1 }
  0xef   : > { %v225_v14 = vpop.f32.mrb[2].mxu0  ;;  %v274_v15 = vpop.f32.mrb[2].mxu1 }
  0xf0   : > { %v512_v16 = vpop.f32.mrb[3].mxu0  ;;  %v518_v17 = vpop.f32.mrb[3].mxu1 }
  0xf5   : > { %v325_v18 = vpop.f32.mrb[4].mxu0  ;;  %v380_v19 = vpop.f32.mrb[4].mxu1 }
  0xf6   : > { %v331_v20 = vadd.f32 %v325_v18, %v272_v11  ;;  %v523_v21 = vpop.f32.mrb[5].mxu0  ;;  %v529_v22 = vpop.f32.mrb[5].mxu1 }
  0xf7   : > { %v328_v24 = vpop.f32.mrb[6].mxu0  ;;  %v383_v25 = vpop.f32.mrb[6].mxu1 }
  0xf8   : > { %v386_v26 = vadd.f32 %v380_v19, %v331_v20  ;;  %v524_v27 = vpop.f32.mrb[7].mxu0  ;;  %v530_v28 = vpop.f32.mrb[7].mxu1 }
  0xfa   : > { %v394_v29 = vadd.f32 %v493_v23, %v386_v26 }
  0xfc   : > { %395 = vst [vmem:[%s163_s24] sm:$0xf] %v394_v29 }
  0xfd   : > { %589 = shalt.err (!%p586_p3)
}
  0xfe   : > { %s590_s6 = scalar_lea.hbm %s740_s28, 64  ;;  %s594_s9 = scalar_lea.hbm %s785_s3, 512 }
  0xff   : > { %p591_p4 = scmp.ne.s32.totalorder %s740_s28, %s590_s6  ;;  %p595_p9 = scmp.lt.u32.totalorder %s740_s28, %s785_s3 }
 0x100   : > { %p596_p10 = scmp.lt.u32.totalorder %s594_s9, %s590_s6  ;;  %p598_p12 = scmp.lt.u32.totalorder %s590_s6, %s740_s28 }
 0x101   : > { %p592_p7 = pnand %p591_p4, %p701_p5 }
 0x102   : > { %p597_p11 = por %p596_p10, %p595_p9 }
 0x103   : > { %p593_p8 = pneg %p592_p7 }
 0x104   : > { %p599_p13 = por %p598_p12, %p597_p11 }
 0x106   : > { %p600_p0 = pnand %p599_p13, %p593_p8 }
 0x108   : > { %603 = shalt.err (!%p600_p0)
}
 0x109   : > { %531 = dma.vmem_to_hbm [thread:$0]  (%p701_p5), %s742_s25, 64, %s740_s28, %s397_s29  }
 0x10a PF: > { %p537_p1 = scmp.ge.s32.totalorder %s638_s15, 2  ;;  %s422_s17 = sand.u32 1, %s626_s12  }
 0x10b   : > { %s423_s19 = scalar_lea.sflag [#allocation3], %s422_s17 }
 0x10c   : > { %p534_p2 = pnand %p537_p1, %p705_p6 }
 0x10e   : > { %621 = dma.done.wait (!%p534_p2), %s423_s19, 64  }
 0x10f   : > { %623 = vsyncadd (!%p534_p2), %s423_s19, 4294967232  ;;  %p13_p3 = scmp.ge.s32.totalorder %s688_s18, 10   ;;  %s788_s12 = smov %s630_s13 }
 0x110   : > { %s789_s13 = smov %s634_s14  ;;  %s790_s14 = smov %s699_s21 }
 0x111   : > { %s791_s15 = smov %s688_s18  ;;  %15 = sbr.rel (!%p13_p3) target bundleno = 3 (0x3), region = 73 }
 0x118   :  { %428 = vsyncpa [#allocation3], 1 }
 0x119   :  { %430 = vsyncpa [#allocation3 + $0x1], 1 }

</bundles_post_ra>
